<compile_context>
chip_gen: v6e
topology: v6e:2x2x1
jax: 0.10.0
libtpu: 0.0.40
codegen_flags: <defaults>
</compile_context>

<pallas_src>
import functools

import jax
import jax.numpy as jnp
from jax import lax
from jax.experimental import pallas as pl
from jax.experimental.pallas import tpu as pltpu


def _lora_kernel(seed_ref, x_ref, wd_ref, wu_ref, o_ref, *, p, training, tm):
    # x_ref : [TM, D_in]
    # wd_ref: [D_in, rank]  (lora_down.weight pre-transposed)
    # wu_ref: [rank, D_out] (lora_up.weight pre-transposed)
    x = x_ref[...]

    # h = lora_down(x) -> [TM, rank], f32 accumulation on the MXU.
    h = jnp.dot(x, wd_ref[...], preferred_element_type=jnp.float32)
    # Match host dtype for the second matmul operand (bf16 weights -> bf16 MXU).
    h = h.astype(wu_ref.dtype)
    # y = lora_up(h) -> [TM, D_out], keep f32 for the epilogue.
    y = jnp.dot(h, wu_ref[...], preferred_element_type=jnp.float32)

    if training and p > 0.0:
        # Counter-based hash RNG (lowbias32-style mixing). Keyed on the GLOBAL
        # row index so every tile gets a distinct mask and the result is
        # independent of the tiling.
        tile = pl.program_id(0).astype(jnp.uint32)
        seed = seed_ref[0].astype(jnp.uint32)
        rows = lax.broadcasted_iota(jnp.uint32, y.shape, 0) + tile * jnp.uint32(tm)
        cols = lax.broadcasted_iota(jnp.uint32, y.shape, 1)
        v = (rows * jnp.uint32(0x9E3779B1)
             + cols * jnp.uint32(0x85EBCA77)
             + seed * jnp.uint32(0xC2B2AE3D))
        v = v ^ (v >> 16)
        v = v * jnp.uint32(0x7FEB352D)
        v = v ^ (v >> 15)
        v = v * jnp.uint32(0x846CA68B)
        v = v ^ (v >> 16)
        # Inverted dropout: keep with prob (1-p) via a single integer compare.
        threshold = jnp.uint32(int(round(p * 4294967296.0)))
        keep = v >= threshold
        y = jnp.where(keep, y * jnp.float32(1.0 / (1.0 - p)), jnp.float32(0.0))

    o_ref[...] = y.astype(o_ref.dtype)


def lora_forward(x, w_down, w_up, seed, *, p=0.1, training=True, tm=None):
    """x: [B, S, D_in]; w_down: [rank, D_in]; w_up: [D_out, rank]; seed: [1] int32."""
    B, S, D_in = x.shape
    rank = w_down.shape[0]
    D_out = w_up.shape[0]
    M = B * S
    x2d = x.reshape(M, D_in)

    # One-time wrapper transposes -> plain row-major contractions in-kernel.
    wd_t = w_down.T  # [D_in, rank]
    wu_t = w_up.T    # [rank, D_out]

    if tm is None:
        # Full array for small M; otherwise a VMEM-friendly tile. Re-derive
        # (smaller) for v7x's 64 MiB VMEM at very large D_in/D_out.
        tm = M if M <= 512 else 512
    n_tiles = pl.cdiv(M, tm)
    Mp = n_tiles * tm
    if Mp != M:
        x2d = jnp.pad(x2d, ((0, Mp - M), (0, 0)))

    dt_bytes = jnp.dtype(x.dtype).itemsize
    cost = pl.CostEstimate(
        flops=2 * M * rank * (D_in + D_out),
        transcendentals=0,
        bytes_accessed=(M * (D_in + D_out) + rank * (D_in + D_out)) * dt_bytes,
    )

    kernel = functools.partial(_lora_kernel, p=p, training=training, tm=tm)

    y2d = pl.pallas_call(
        kernel,
        out_shape=jax.ShapeDtypeStruct((Mp, D_out), x.dtype),
        grid_spec=pltpu.PrefetchScalarGridSpec(
            num_scalar_prefetch=1,           # seed -> SMEM, passed to index_maps
            grid=(n_tiles,),
            in_specs=[
                pl.BlockSpec((tm, D_in), lambda i, s: (i, 0)),     # x tile
                pl.BlockSpec((D_in, rank), lambda i, s: (0, 0)),   # W_down^T (resident)
                pl.BlockSpec((rank, D_out), lambda i, s: (0, 0)),  # W_up^T   (resident)
            ],
            out_specs=pl.BlockSpec((tm, D_out), lambda i, s: (i, 0)),
        ),
        compiler_params=pltpu.CompilerParams(
            dimension_semantics=("parallel",)),  # shard row tiles across TCs (v7x)
        cost_estimate=cost,
    )(seed, x2d, wd_t, wu_t)

    return y2d[:M].reshape(B, S, D_out)


if __name__ == "__main__":
    # Small, deterministic setup consistent with a Linear host.
    B, S, D_in, D_out, rank = 2, 8, 32, 32, 4
    p_drop = 0.1

    key = jax.random.PRNGKey(0)
    kx, kd, ku = jax.random.split(key, 3)

    x = jax.random.normal(kx, (B, S, D_in), dtype=jnp.float32)
    # Module zero-inits lora_up; use small random values so output is nontrivial.
    w_down = jax.random.normal(kd, (rank, D_in), dtype=jnp.float32) * 0.1
    w_up = jax.random.normal(ku, (D_out, rank), dtype=jnp.float32) * 0.1

    seed = jnp.array([1234], dtype=jnp.int32)

    y = lora_forward(x, w_down, w_up, seed, p=p_drop, training=True)
    jax.block_until_ready(y)

    assert y.shape == (B, S, D_out)

    # Sanity check against a pure-JAX reference with dropout disabled.
    y_eval = lora_forward(x, w_down, w_up, seed, p=p_drop, training=False)
    ref = (x.reshape(-1, D_in) @ w_down.T @ w_up.T).reshape(B, S, D_out)
    assert jnp.allclose(y_eval, ref, atol=1e-4, rtol=1e-4)

    print("KERNEL_OK")
</pallas_src>

<mosaic_0001>
module attributes {stable_mosaic.version = 11 : i64} {
  func.func @_lora_kernel(%arg0: i32, %arg1: memref<1xi32, #tpu.memory_space<smem>>, %arg2: memref<16x32xf32, #tpu.memory_space<vmem>>, %arg3: memref<32x4xf32, #tpu.memory_space<vmem>>, %arg4: memref<4x32xf32, #tpu.memory_space<vmem>>, %arg5: memref<16x32xf32, #tpu.memory_space<vmem>>) attributes {dimension_semantics = [#tpu.dimension_semantics<parallel>], iteration_bounds = array<i64: 1>, scalar_prefetch = 1 : i64, scratch_operands = 0 : i64, tpu.core_type = #tpu.core_type<tc>, window_params = [{transform_indices = @transform_0, window_bounds = array<i64: 16, 32>}, {pipeline_mode = #tpu.pipeline_mode<synchronous>, transform_indices = @transform_1, window_bounds = array<i64: 32, 4>}, {pipeline_mode = #tpu.pipeline_mode<synchronous>, transform_indices = @transform_2, window_bounds = array<i64: 4, 32>}, {transform_indices = @transform_3, window_bounds = array<i64: 16, 32>}]} {
    %c0 = arith.constant 0 : index
    %c0_0 = arith.constant 0 : index
    %0 = vector.load %arg2[%c0, %c0_0] : memref<16x32xf32, #tpu.memory_space<vmem>>, vector<16x32xf32>
    %c0_1 = arith.constant 0 : index
    %c0_2 = arith.constant 0 : index
    %1 = vector.load %arg3[%c0_1, %c0_2] : memref<32x4xf32, #tpu.memory_space<vmem>>, vector<32x4xf32>
    %cst = arith.constant dense<0.000000e+00> : vector<16x4xf32>
    %2 = tpu.matmul %0, %1, %cst {dimension_numbers = #tpu.dot_dimension_numbers<[1], [0], [0], [1], [0, 0, 1, 1], [], []>} : vector<16x32xf32>, vector<32x4xf32>, vector<16x4xf32> -> vector<16x4xf32>
    %c0_3 = arith.constant 0 : index
    %c0_4 = arith.constant 0 : index
    %3 = vector.load %arg4[%c0_3, %c0_4] : memref<4x32xf32, #tpu.memory_space<vmem>>, vector<4x32xf32>
    %cst_5 = arith.constant dense<0.000000e+00> : vector<16x32xf32>
    %4 = tpu.matmul %2, %3, %cst_5 {dimension_numbers = #tpu.dot_dimension_numbers<[1], [0], [0], [1], [0, 0, 1, 1], [], []>} : vector<16x4xf32>, vector<4x32xf32>, vector<16x32xf32> -> vector<16x32xf32>
    %c0_6 = arith.constant 0 : index
    %5 = memref.load %arg1[%c0_6] : memref<1xi32, #tpu.memory_space<smem>>
    %6 = tpu.iota {dimensions = array<i32: 0>} : vector<16x32xi32>
    %c16_i32 = arith.constant 16 : i32
    %7 = arith.muli %arg0, %c16_i32 : i32
    %8 = vector.broadcast %7 : i32 to vector<16x32xi32>
    %9 = arith.addi %6, %8 : vector<16x32xi32>
    %10 = tpu.iota {dimensions = array<i32: 1>} : vector<16x32xi32>
    %c-1640531535_i32 = arith.constant -1640531535 : i32
    %11 = vector.broadcast %c-1640531535_i32 : i32 to vector<16x32xi32>
    %12 = arith.muli %9, %11 : vector<16x32xi32>
    %c-2048144777_i32 = arith.constant -2048144777 : i32
    %13 = vector.broadcast %c-2048144777_i32 : i32 to vector<16x32xi32>
    %14 = arith.muli %10, %13 : vector<16x32xi32>
    %15 = arith.addi %12, %14 : vector<16x32xi32>
    %c-1028477379_i32 = arith.constant -1028477379 : i32
    %16 = arith.muli %5, %c-1028477379_i32 : i32
    %17 = vector.broadcast %16 : i32 to vector<16x32xi32>
    %18 = arith.addi %15, %17 : vector<16x32xi32>
    %c16_i32_7 = arith.constant 16 : i32
    %19 = vector.broadcast %c16_i32_7 : i32 to vector<16x32xi32>
    %20 = arith.shrui %18, %19 : vector<16x32xi32>
    %21 = arith.xori %18, %20 : vector<16x32xi32>
    %c2146121005_i32 = arith.constant 2146121005 : i32
    %22 = vector.broadcast %c2146121005_i32 : i32 to vector<16x32xi32>
    %23 = arith.muli %21, %22 : vector<16x32xi32>
    %c15_i32 = arith.constant 15 : i32
    %24 = vector.broadcast %c15_i32 : i32 to vector<16x32xi32>
    %25 = arith.shrui %23, %24 : vector<16x32xi32>
    %26 = arith.xori %23, %25 : vector<16x32xi32>
    %c-2073254261_i32 = arith.constant -2073254261 : i32
    %27 = vector.broadcast %c-2073254261_i32 : i32 to vector<16x32xi32>
    %28 = arith.muli %26, %27 : vector<16x32xi32>
    %c16_i32_8 = arith.constant 16 : i32
    %29 = vector.broadcast %c16_i32_8 : i32 to vector<16x32xi32>
    %30 = arith.shrui %28, %29 : vector<16x32xi32>
    %31 = arith.xori %28, %30 : vector<16x32xi32>
    %c429496730_i32 = arith.constant 429496730 : i32
    %32 = vector.broadcast %c429496730_i32 : i32 to vector<16x32xi32>
    %33 = arith.cmpi uge, %31, %32 : vector<16x32xi32>
    %cst_9 = arith.constant 1.11111116 : f32
    %34 = vector.broadcast %cst_9 : f32 to vector<16x32xf32>
    %35 = arith.mulf %4, %34 : vector<16x32xf32>
    %cst_10 = arith.constant 0.000000e+00 : f32
    %36 = vector.broadcast %cst_10 : f32 to vector<16x32xf32>
    %37 = arith.select %33, %35, %36 : vector<16x32xi1>, vector<16x32xf32>
    %c0_11 = arith.constant 0 : index
    %c0_12 = arith.constant 0 : index
    %38 = vector.load %arg5[%c0_11, %c0_12] : memref<16x32xf32, #tpu.memory_space<vmem>>, vector<16x32xf32>
    tpu.vector_store %arg5[%c0_11, %c0_12], %37 {strides = array<i32>} : memref<16x32xf32, #tpu.memory_space<vmem>>, vector<16x32xf32>,
    return
  }
  func.func @transform_0(%arg0: i32, %arg1: memref<1xi32, #tpu.memory_space<smem>>) -> (i32, i32) {
    %c0_i32 = arith.constant 0 : i32
    %c0_i32_0 = arith.constant 0 : i32
    return %arg0, %c0_i32 : i32, i32
  }
  func.func @transform_1(%arg0: i32, %arg1: memref<1xi32, #tpu.memory_space<smem>>) -> (i32, i32) {
    %c0_i32 = arith.constant 0 : i32
    %c0_i32_0 = arith.constant 0 : i32
    %c0_i32_1 = arith.constant 0 : i32
    return %c0_i32, %c0_i32_0 : i32, i32
  }
  func.func @transform_2(%arg0: i32, %arg1: memref<1xi32, #tpu.memory_space<smem>>) -> (i32, i32) {
    %c0_i32 = arith.constant 0 : i32
    %c0_i32_0 = arith.constant 0 : i32
    %c0_i32_1 = arith.constant 0 : i32
    return %c0_i32, %c0_i32_0 : i32, i32
  }
  func.func @transform_3(%arg0: i32, %arg1: memref<1xi32, #tpu.memory_space<smem>>) -> (i32, i32) {
    %c0_i32 = arith.constant 0 : i32
    %c0_i32_0 = arith.constant 0 : i32
    return %arg0, %c0_i32 : i32, i32
  }
}

</mosaic_0001>

<bundles_post_ra>
// kernel: tpu_custom_call.1
= control target key start
LH: loop header
LB: loop body
LE: loop exit
PB: predicated region body
PF: predicated region fallthrough
CT: control target
= control target key end

     0   :  { %vm23_vm0 = vcmask 261120   ;;  %s365_s0 = inlined_call_operand.<no memory space> [shape: s32[1], index: 0, kind: input, shape index: {}]   ;;  %s366_s1 = inlined_call_operand.vmem [shape: f32[16,32], index: 1, kind: input, shape index: {}]   ;;  %s367_s2 = inlined_call_operand.vmem [shape: f32[32,4], index: 2, kind: input, shape index: {}]   ;;  %s368_s3 = inlined_call_operand.vmem [shape: f32[4,32], index: 3, kind: input, shape index: {}]   ;;  %s369_s4 = inlined_call_operand.hbm [shape: f32[16,32], index: 4, kind: output, shape index: {}]  }
   0x1   :  { %v22_v0 = vld [vmem:[%s367_s2 + $0x18] sm:$0xff]  ;;  %v21_v1 = vld [vmem:[%s367_s2 + $0x10] sm:$0xff]  ;;  %v17_v2 = vld [vmem:[%s366_s1] sm:$0xff] }
   0x2   :  { %265 = vmatprep.subr.mxu0 %v22_v0  ;;  %v20_v3 = vld [vmem:[%s367_s2 + $0x8] sm:$0xff]  ;;  %273 = vmatprep.mubr.msk.f32.mxu0 %vm23_vm0, %v17_v2 }
   0x3   :  { %266 = vmatpush3.msra.mxu0 %v22_v0 }
   0x4   :  { %10 = vsyncpa [#allocation5], 0  ;;  %267 = vmatprep.subr.mxu0 %v21_v1  ;;  %v19_v4 = vld [vmem:[%s367_s2] sm:$0xff]  ;;  %v18_v5 = vld [vmem:[%s366_s1 + $0x8] sm:$0xff]  ;;  %vm113_vm1 = vcmask 1043456   ;;  %vm106_vm2 = vcmask 31744   ;;  %v193_v9 = vlaneseq }
   0x5   :  { %268 = vmatpush3.msra.mxu0 %v21_v1  ;;  %v105_v6 = vld [vmem:[%s368_s3] sm:$0xf]  ;;  %s207_s29 = smul.u32 3266489917, %s365_s0  ;;  %s306_s0 = smov [#allocation4]  }
   0x6   :  { %269 = vmatprep.subr.mxu0 %v20_v3  ;;  %276 = vmatprep.subr.msk.mxu1 %vm113_vm1, %v105_v6  ;;  %v194_v10 = vshrl.u32 %v193_v9, 7  ;;  %v201_v12 = vand.u32 127, %v193_v9  ;;  %s240_s3 = sshll.u32 %s306_s0, 4  ;;  %s241_s3 = int_to_ptr.vmem [resolvable:$true] %s240_s3 }
   0x7   :  { %270 = vmatpush3.msra.mxu0 %v20_v3  ;;  %277 = vmatpush3.msk.msra.mxu1 %vm113_vm1, %v105_v6  ;;  %v208_v17 = vstv %s207_s29  ;;  %s284_s30 = scalar_lea.vmem %s241_s3, 256  ;;  %p289_p1 = scmp.lt.s32.totalorder %s241_s3, %s241_s3 }
   0x8   :  { %271 = vmatprep.subr.mxu0 %v19_v4  ;;  %v195_v11 = vadd.s32 8, %v194_v10  ;;  %v204_v14 = vmul.u32 2246822519, %v201_v12  ;;  %v202_v15 = vmul.u32 2654435761, %v194_v10  ;;  %p285_p0 = scmp.ne.s32.totalorder %s241_s3, %s284_s30  ;;  %p290_p2 = scmp.lt.s32.totalorder %s284_s30, %s284_s30 }
   0x9   :  { %272 = vmatpush3.msra.mxu0 %v19_v4 }
   0xa   :  { %274 = vmatmul.mubr.msk.f32.vlgmr.msra.gmra.mxu0 %vm23_vm0, %v18_v5  ;;  %v203_v13 = vmul.u32 2654435761, %v195_v11  ;;  %v205_v18 = vadd.s32 %v204_v14, %v202_v15  ;;  %p291_p3 = por %p290_p2, %p289_p1 }
   0xc   :  { %v206_v16 = vadd.s32 %v204_v14, %v203_v13  ;;  %v209_v20 = vadd.s32 %v208_v17, %v205_v18  ;;  %p292_p4 = pnand %p291_p3, %p285_p0 }
   0xe   :  { %v210_v19 = vadd.s32 %v208_v17, %v206_v16  ;;  %v211_v22 = vshrl.u32 %v209_v20, 16 }
  0x10   :  { %v212_v21 = vshrl.u32 %v210_v19, 16  ;;  %v213_v24 = vxor.u32 %v211_v22, %v209_v20 }
  0x12   :  { %v214_v23 = vxor.u32 %v212_v21, %v210_v19  ;;  %v215_v26 = vmul.u32 2146121005, %v213_v24 }
  0x14   :  { %v216_v25 = vmul.u32 2146121005, %v214_v23  ;;  %v217_v28 = vshrl.u32 %v215_v26, 15 }
  0x16   :  { %v218_v27 = vshrl.u32 %v216_v25, 15  ;;  %v219_v30 = vxor.u32 %v217_v28, %v215_v26 }
  0x18   :  { %v220_v29 = vxor.u32 %v218_v27, %v216_v25  ;;  %v221_v32 = vmul.u32 2221713035, %v219_v30 }
  0x1a   :  { %v222_v31 = vmul.u32 2221713035, %v220_v29  ;;  %v223_v34 = vshrl.u32 %v221_v32, 16 }
  0x1c   :  { %v224_v33 = vshrl.u32 %v222_v31, 16  ;;  %v225_v36 = vxor.u32 %v223_v34, %v221_v32 }
  0x1e   :  { %v226_v35 = vxor.u32 %v224_v33, %v222_v31  ;;  %vm227_vm4 = vcmp.ge.u32.totalorder %v225_v36, 429496730 }
  0x20   :  { %vm228_vm3 = vcmp.ge.u32.totalorder %v226_v35, 429496730 }
  0xca   :  { %v275_v7 = vpop.f32.mrf.mxu0 }
  0xcc   :  { %v96_v8 = vpop.f32.mrf.mxu0 }
  0xcd   :  { %278 = vmatprep.mubr.msk.f32.mxu1 %vm106_vm2, %v96_v8 }
  0xce   :  { %279 = vmatmul.mubr.msk.f32.vlgmr.msra.gmra.mxu1 %vm106_vm2, %v275_v7 }
 0x18e   :  { %v280_v37 = vpop.f32.mrf.mxu1 }
 0x18f   :  { %v230_v38 = vmul.f32 1.1111112, %v280_v37 }
 0x190   :  { %v183_v39 = vpop.f32.mrf.mxu1 }
 0x191   :  { %v232_v40 = vsel %vm228_vm3, %v230_v38, 0.0  ;;  %v229_v41 = vmul.f32 1.1111112, %v183_v39 }
 0x192   :  { %234 = vst.msk [vmem:[#allocation4 + $0x8] sm:$0xff] %vm23_vm0, %v232_v40 }
 0x193   :  { %v231_v42 = vsel %vm227_vm4, %v229_v41, 0.0 }
 0x194   :  { %233 = vst.msk [vmem:[#allocation4] sm:$0xff] %vm23_vm0, %v231_v42 }
 0x195   :  { %295 = shalt.err (!%p292_p4)
}
 0x196   :  { %s307_s5 = smov 128   ;;  %s308_s6 = smov 8  }
 0x197   :  { %246 = dma.vmem_to_hbm [thread:$0]  %s241_s3, 256, %s369_s4, [#allocation5], %s307_s5, %s307_s5, %s308_s6  }
 0x198   :  { %304 = dma.done.wait [#allocation5], 256  }
 0x199   :  { %305 = vsyncadd [#allocation5], 4294967040 }
 0x19a   :  { %250 = vsyncpa [#allocation5], 1 }

</bundles_post_ra>
